<compile_context>
chip_gen: v7x
topology: tpu7x:2x2x1
jax: 0.10.0
libtpu: 0.0.40
codegen_flags: <defaults>
</compile_context>

<pallas_src>
import functools

import jax
import jax.numpy as jnp
from jax.experimental import pallas as pl
from jax.experimental.pallas import tpu as pltpu


# Hidden sizes of the S_Net MLP (GCNConv->64, lin1->32, lin2->16, lin3->C).
H1, H2, H3 = 64, 32, 16


def _pack_layout(T, F, C):
    """Row offsets of each tensor inside the single packed parameter buffer.

    All offsets are multiples of 16 (bf16 sublane-tile aligned); every lane
    slice starts at lane 0.
    """
    o1 = T * F            # end of W1_eff rows        (48)
    o2 = o1 + T * H1      # end of W2_bd rows         (240)
    o3 = o2 + T * H2      # end of W3_bd rows         (336)
    o4 = o3 + T * H3      # end of W4_cat rows        (384); bias rows follow
    lanes = T * H1        # widest lane extent        (192)
    rows = o4 + 4 * 16    # 4 bias rows, each on its own 16-row boundary (448)
    return o1, o2, o3, o4, rows, lanes


# -----------------------------------------------------------------------------
# Pallas kernel: entire Net.forward in one gridless invocation.
# -----------------------------------------------------------------------------
def net_kernel(a_ref, x_ref, wp_ref, out_ref, *, T, F, C):
    o1, o2, o3, o4, _, _ = _pack_layout(T, F, C)

    # Packed parameters (bf16 storage).  Static, tile-aligned slices.
    w1 = wp_ref[0:o1, :]                      # (T*F,  T*64) share_var folded in
    w2 = wp_ref[o1:o2, 0:T * H2]              # (T*64, T*32) block-diagonal
    w3 = wp_ref[o2:o3, 0:T * H3]              # (T*32, T*16) block-diagonal
    w4 = wp_ref[o3:o4, 0:C]                   # (T*16, C)    row-stacked (time sum)
    # Biases promoted to f32 so all elementwise math stays f32.
    b1 = wp_ref[o4:o4 + 1, :].astype(jnp.float32)                 # (1, T*64)
    b2 = wp_ref[o4 + 16:o4 + 17, 0:T * H2].astype(jnp.float32)    # (1, T*32)
    b3 = wp_ref[o4 + 32:o4 + 33, 0:T * H3].astype(jnp.float32)    # (1, T*16)
    b4 = wp_ref[o4 + 48:o4 + 49, 0:C].astype(jnp.float32)         # (1, C)

    # Shared A_hat propagation, batched over all T timesteps in one MXU pass.
    ax = jnp.dot(a_ref[...], x_ref[...].astype(jnp.bfloat16),
                 preferred_element_type=jnp.float32)              # (N, T*F) f32

    # Block-diagonal S_Net stack: one matmul per layer, no per-t slicing.
    # Dropout(0.12) == identity (inference).
    z = jnp.dot(ax.astype(jnp.bfloat16), w1, preferred_element_type=jnp.float32)
    z = jnp.maximum(z + b1, 0.0)              # GCNConv bias + ReLU
    z = jnp.dot(z.astype(jnp.bfloat16), w2, preferred_element_type=jnp.float32)
    z = jnp.maximum(z + b2, 0.0)              # lin1 + ReLU
    z = jnp.dot(z.astype(jnp.bfloat16), w3, preferred_element_type=jnp.float32)
    z = jnp.maximum(z + b3, 0.0)              # lin2 + ReLU
    z = jnp.dot(z.astype(jnp.bfloat16), w4, preferred_element_type=jnp.float32)
    z = z + b4                                # lin3; sum over t folded into w4/b4

    # log_softmax over classes (dim=1), numerically stable, f32.
    m = jnp.max(z, axis=1, keepdims=True)
    lse = jnp.log(jnp.sum(jnp.exp(z - m), axis=1, keepdims=True)) + m
    out_ref[...] = z - lse


def net_forward(a_bf16, x_cat, wpack, *, T, F, C):
    """a_bf16: (N, N) normalized adjacency (bf16); x_cat: (N, T*F) node-major
    features (f32); wpack: packed parameter buffer (bf16).
    Returns log_softmax logits of shape (N, C)."""
    N = x_cat.shape[0]
    vmem = pl.BlockSpec(memory_space=pltpu.MemorySpace.VMEM)
    kernel = functools.partial(net_kernel, T=T, F=F, C=C)
    return pl.pallas_call(
        kernel,
        out_shape=jax.ShapeDtypeStruct((N, C), jnp.float32),
        in_specs=[vmem, vmem, vmem],
        out_specs=vmem,
    )(a_bf16, x_cat, wpack)


# -----------------------------------------------------------------------------
# One-time, init-side parameter packing (not in the per-call hot path).
# -----------------------------------------------------------------------------
def pack_params(params, T, F, C):
    o1, o2, o3, o4, rows, lanes = _pack_layout(T, F, C)

    # share_var recurrence (sv_0=0, sv_{t+1}=0.05*sv_t + 0.1*x_t) folded into
    # the first layer: H_t = sum_j c[j,t] * x_j.
    def sv_coeff(j, t):
        if j == t:
            return 1.0
        if j < t:
            return 0.1 * (0.05 ** (t - 1 - j))
        return 0.0

    w1_eff = jnp.zeros((T * F, T * H1), jnp.float32)
    w2_bd = jnp.zeros((T * H1, T * H2), jnp.float32)
    w3_bd = jnp.zeros((T * H2, T * H3), jnp.float32)
    for t in range(T):
        for j in range(T):
            c = sv_coeff(j, t)
            if c != 0.0:
                w1_eff = w1_eff.at[j * F:(j + 1) * F,
                                   t * H1:(t + 1) * H1].set(c * params["W1"][t])
        w2_bd = w2_bd.at[t * H1:(t + 1) * H1, t * H2:(t + 1) * H2].set(params["W2"][t])
        w3_bd = w3_bd.at[t * H2:(t + 1) * H2, t * H3:(t + 1) * H3].set(params["W3"][t])
    w4_cat = params["W4"].reshape(T * H3, C)          # [W4_0; W4_1; W4_2]
    b4_sum = params["b4"].sum(axis=0)

    pack = jnp.zeros((rows, lanes), jnp.float32)
    pack = pack.at[0:o1, :].set(w1_eff)
    pack = pack.at[o1:o2, 0:T * H2].set(w2_bd)
    pack = pack.at[o2:o3, 0:T * H3].set(w3_bd)
    pack = pack.at[o3:o4, 0:C].set(w4_cat)
    pack = pack.at[o4, :].set(params["b1"].reshape(T * H1))
    pack = pack.at[o4 + 16, 0:T * H2].set(params["b2"].reshape(T * H2))
    pack = pack.at[o4 + 32, 0:T * H3].set(params["b3"].reshape(T * H3))
    pack = pack.at[o4 + 48, 0:C].set(b4_sum)
    return pack.astype(jnp.bfloat16)


# -----------------------------------------------------------------------------
# Pure-JAX reference (unpacked, f32) for a sanity check.
# -----------------------------------------------------------------------------
def net_reference(a_hat, xs, params):
    T, N, F = xs.shape
    C = params["W4"].shape[-1]
    sv = jnp.zeros((N, F), jnp.float32)
    out = jnp.zeros((N, C), jnp.float32)
    for i in range(T):
        h = xs[i] + sv
        z = a_hat @ h @ params["W1"][i] + params["b1"][i]
        z = jnp.maximum(z, 0.0)
        z = z @ params["W2"][i] + params["b2"][i]
        z = jnp.maximum(z, 0.0)
        z = z @ params["W3"][i] + params["b3"][i]
        z = jnp.maximum(z, 0.0)
        z = z @ params["W4"][i] + params["b4"][i]
        out = out + z
        sv = 0.05 * sv + 0.1 * xs[i]
    return jax.nn.log_softmax(out, axis=1)


# -----------------------------------------------------------------------------
# Deterministic setup glue: graph, normalized adjacency, parameters.
# -----------------------------------------------------------------------------
def build_normalized_adjacency(key, n_nodes, n_edges):
    """Dense D^-1/2 (A + I) D^-1/2 from a deterministic random edge_index."""
    src = jax.random.randint(key, (n_edges,), 0, n_nodes)
    dst = jax.random.randint(jax.random.fold_in(key, 1), (n_edges,), 0, n_nodes)
    adj = jnp.zeros((n_nodes, n_nodes), jnp.float32)
    adj = adj.at[src, dst].set(1.0)
    adj = jnp.maximum(adj, adj.T)                      # undirected
    adj = adj + jnp.eye(n_nodes, dtype=jnp.float32)    # self-loops
    deg = jnp.sum(adj, axis=1)
    d_inv_sqrt = 1.0 / jnp.sqrt(deg)
    return adj * d_inv_sqrt[:, None] * d_inv_sqrt[None, :]


def init_params(key, T, F, C):
    keys = jax.random.split(key, 8)
    def u(k, shape, fan_in):
        bound = 1.0 / jnp.sqrt(fan_in)
        return jax.random.uniform(k, shape, jnp.float32, -bound, bound)
    return {
        "W1": u(keys[0], (T, F, H1), F),    "b1": u(keys[1], (T, H1), F),
        "W2": u(keys[2], (T, H1, H2), H1),  "b2": u(keys[3], (T, H2), H1),
        "W3": u(keys[4], (T, H2, H3), H2),  "b3": u(keys[5], (T, H3), H2),
        "W4": u(keys[6], (T, H3, C), H3),   "b4": u(keys[7], (T, C), H3),
    }


if __name__ == "__main__":
    T_STEP = 3        # number of S_Nets / time steps
    N_NODES = 32      # graph nodes
    NUM_FEATURES = 16
    NUM_CLASSES = 8
    N_EDGES = 64

    root = jax.random.PRNGKey(0)
    k_adj, k_x, k_p = jax.random.split(root, 3)

    a_hat = build_normalized_adjacency(k_adj, N_NODES, N_EDGES)
    xs = jax.random.normal(k_x, (T_STEP, N_NODES, NUM_FEATURES), jnp.float32)
    params = init_params(k_p, T_STEP, NUM_FEATURES, NUM_CLASSES)

    # One-time init-side packing (outside the per-call hot path).
    a_bf16 = a_hat.astype(jnp.bfloat16)
    wpack = pack_params(params, T_STEP, NUM_FEATURES, NUM_CLASSES)
    # Node-major (N, T*F) layout so the kernel needs no in-kernel lane concat;
    # in a real pipeline the data loader emits this layout directly.
    x_cat = jnp.transpose(xs, (1, 0, 2)).reshape(N_NODES, T_STEP * NUM_FEATURES)

    out = net_forward(a_bf16, x_cat, wpack,
                      T=T_STEP, F=NUM_FEATURES, C=NUM_CLASSES)
    out = jax.block_until_ready(out)

    ref = net_reference(a_hat, xs, params)
    assert out.shape == (N_NODES, NUM_CLASSES)
    # bf16 MXU operands (f32 accumulation): tolerance loosened vs the pure-f32
    # reference accordingly.
    assert jnp.allclose(out, ref, atol=3e-2, rtol=3e-2), "mismatch vs reference"

    print("KERNEL_OK")
</pallas_src>

<mosaic_0001>
module attributes {stable_mosaic.version = 11 : i64} {
  func.func @net_kernel(%arg0: memref<32x32xbf16, #tpu.memory_space<vmem>>, %arg1: memref<32x48xf32, #tpu.memory_space<vmem>>, %arg2: memref<448x192xbf16, #tpu.memory_space<vmem>>, %arg3: memref<32x8xf32, #tpu.memory_space<vmem>>) attributes {dimension_semantics = [], scalar_prefetch = 0 : i64, scratch_operands = 0 : i64, tpu.core_type = #tpu.core_type<tc>} {
    %c0 = arith.constant 0 : index
    %c0_0 = arith.constant 0 : index
    %0 = vector.load %arg2[%c0, %c0_0] : memref<448x192xbf16, #tpu.memory_space<vmem>>, vector<48x192xbf16>
    %c48 = arith.constant 48 : index
    %c0_1 = arith.constant 0 : index
    %1 = vector.load %arg2[%c48, %c0_1] : memref<448x192xbf16, #tpu.memory_space<vmem>>, vector<192x96xbf16>
    %c240 = arith.constant 240 : index
    %c0_2 = arith.constant 0 : index
    %2 = vector.load %arg2[%c240, %c0_2] : memref<448x192xbf16, #tpu.memory_space<vmem>>, vector<96x48xbf16>
    %c336 = arith.constant 336 : index
    %c0_3 = arith.constant 0 : index
    %3 = vector.load %arg2[%c336, %c0_3] : memref<448x192xbf16, #tpu.memory_space<vmem>>, vector<48x8xbf16>
    %c384 = arith.constant 384 : index
    %c0_4 = arith.constant 0 : index
    %4 = vector.load %arg2[%c384, %c0_4] : memref<448x192xbf16, #tpu.memory_space<vmem>>, vector<1x192xbf16>
    %5 = arith.extf %4 : vector<1x192xbf16> to vector<1x192xf32>
    %c400 = arith.constant 400 : index
    %c0_5 = arith.constant 0 : index
    %6 = vector.load %arg2[%c400, %c0_5] : memref<448x192xbf16, #tpu.memory_space<vmem>>, vector<1x96xbf16>
    %7 = arith.extf %6 : vector<1x96xbf16> to vector<1x96xf32>
    %c416 = arith.constant 416 : index
    %c0_6 = arith.constant 0 : index
    %8 = vector.load %arg2[%c416, %c0_6] : memref<448x192xbf16, #tpu.memory_space<vmem>>, vector<1x48xbf16>
    %9 = arith.extf %8 : vector<1x48xbf16> to vector<1x48xf32>
    %c432 = arith.constant 432 : index
    %c0_7 = arith.constant 0 : index
    %10 = vector.load %arg2[%c432, %c0_7] : memref<448x192xbf16, #tpu.memory_space<vmem>>, vector<1x8xbf16>
    %11 = arith.extf %10 : vector<1x8xbf16> to vector<1x8xf32>
    %c0_8 = arith.constant 0 : index
    %c0_9 = arith.constant 0 : index
    %12 = vector.load %arg0[%c0_8, %c0_9] : memref<32x32xbf16, #tpu.memory_space<vmem>>, vector<32x32xbf16>
    %c0_10 = arith.constant 0 : index
    %c0_11 = arith.constant 0 : index
    %13 = vector.load %arg1[%c0_10, %c0_11] : memref<32x48xf32, #tpu.memory_space<vmem>>, vector<32x48xf32>
    %14 = arith.truncf %13 : vector<32x48xf32> to vector<32x48xbf16>
    %cst = arith.constant dense<0.000000e+00> : vector<32x48xf32>
    %15 = tpu.matmul %12, %14, %cst {dimension_numbers = #tpu.dot_dimension_numbers<[1], [0], [0], [1], [0, 0, 1, 1], [], []>} : vector<32x32xbf16>, vector<32x48xbf16>, vector<32x48xf32> -> vector<32x48xf32>
    %16 = arith.truncf %15 : vector<32x48xf32> to vector<32x48xbf16>
    %cst_12 = arith.constant dense<0.000000e+00> : vector<32x192xf32>
    %17 = tpu.matmul %16, %0, %cst_12 {dimension_numbers = #tpu.dot_dimension_numbers<[1], [0], [0], [1], [0, 0, 1, 1], [], []>} : vector<32x48xbf16>, vector<48x192xbf16>, vector<32x192xf32> -> vector<32x192xf32>
    %18 = vector.broadcast %5 : vector<1x192xf32> to vector<32x192xf32>
    %19 = arith.addf %17, %18 : vector<32x192xf32>
    %cst_13 = arith.constant 0.000000e+00 : f32
    %20 = vector.broadcast %cst_13 : f32 to vector<32x192xf32>
    %21 = arith.maximumf %19, %20 : vector<32x192xf32>
    %22 = arith.truncf %21 : vector<32x192xf32> to vector<32x192xbf16>
    %cst_14 = arith.constant dense<0.000000e+00> : vector<32x96xf32>
    %23 = tpu.matmul %22, %1, %cst_14 {dimension_numbers = #tpu.dot_dimension_numbers<[1], [0], [0], [1], [0, 0, 1, 1], [], []>} : vector<32x192xbf16>, vector<192x96xbf16>, vector<32x96xf32> -> vector<32x96xf32>
    %24 = vector.broadcast %7 : vector<1x96xf32> to vector<32x96xf32>
    %25 = arith.addf %23, %24 : vector<32x96xf32>
    %cst_15 = arith.constant 0.000000e+00 : f32
    %26 = vector.broadcast %cst_15 : f32 to vector<32x96xf32>
    %27 = arith.maximumf %25, %26 : vector<32x96xf32>
    %28 = arith.truncf %27 : vector<32x96xf32> to vector<32x96xbf16>
    %cst_16 = arith.constant dense<0.000000e+00> : vector<32x48xf32>
    %29 = tpu.matmul %28, %2, %cst_16 {dimension_numbers = #tpu.dot_dimension_numbers<[1], [0], [0], [1], [0, 0, 1, 1], [], []>} : vector<32x96xbf16>, vector<96x48xbf16>, vector<32x48xf32> -> vector<32x48xf32>
    %30 = vector.broadcast %9 : vector<1x48xf32> to vector<32x48xf32>
    %31 = arith.addf %29, %30 : vector<32x48xf32>
    %cst_17 = arith.constant 0.000000e+00 : f32
    %32 = vector.broadcast %cst_17 : f32 to vector<32x48xf32>
    %33 = arith.maximumf %31, %32 : vector<32x48xf32>
    %34 = arith.truncf %33 : vector<32x48xf32> to vector<32x48xbf16>
    %cst_18 = arith.constant dense<0.000000e+00> : vector<32x8xf32>
    %35 = tpu.matmul %34, %3, %cst_18 {dimension_numbers = #tpu.dot_dimension_numbers<[1], [0], [0], [1], [0, 0, 1, 1], [], []>} : vector<32x48xbf16>, vector<48x8xbf16>, vector<32x8xf32> -> vector<32x8xf32>
    %36 = vector.broadcast %11 : vector<1x8xf32> to vector<32x8xf32>
    %37 = arith.addf %35, %36 : vector<32x8xf32>
    %cst_19 = arith.constant dense<0xFF800000> : vector<32xf32>
    %38 = vector.multi_reduction <maximumf>, %37, %cst_19 [1] : vector<32x8xf32> to vector<32xf32>
    %39 = vector.shape_cast %38 : vector<32xf32> to vector<32x1xf32>
    %40 = vector.broadcast %39 : vector<32x1xf32> to vector<32x8xf32>
    %41 = arith.subf %37, %40 : vector<32x8xf32>
    %42 = math.exp %41 : vector<32x8xf32>
    %cst_20 = arith.constant dense<0.000000e+00> : vector<32xf32>
    %43 = vector.multi_reduction <add>, %42, %cst_20 [1] : vector<32x8xf32> to vector<32xf32>
    %44 = vector.shape_cast %43 : vector<32xf32> to vector<32x1xf32>
    %45 = math.log %44 : vector<32x1xf32>
    %46 = arith.addf %45, %39 : vector<32x1xf32>
    %47 = vector.broadcast %46 : vector<32x1xf32> to vector<32x8xf32>
    %48 = arith.subf %37, %47 : vector<32x8xf32>
    %c0_21 = arith.constant 0 : index
    %c0_22 = arith.constant 0 : index
    %49 = vector.load %arg3[%c0_21, %c0_22] : memref<32x8xf32, #tpu.memory_space<vmem>>, vector<32x8xf32>
    tpu.vector_store %arg3[%c0_21, %c0_22], %48 {strides = array<i32>} : memref<32x8xf32, #tpu.memory_space<vmem>>, vector<32x8xf32>,
    return
  }
}

</mosaic_0001>

<bundles_post_ra>
// kernel: tpu_custom_call.1
= control target key start
LH: loop header
LB: loop body
LE: loop exit
PB: predicated region body
PF: predicated region fallthrough
CT: control target
= control target key end

     0   :  { %vm92_vm0 = vcmask 261120   ;;  %v777_v14 = vmov 0   ;;  %vm188_vm1 = vcmask 392192   ;;  %v150_v35 = vlaneseq  ;;  %s956_s1 = inlined_call_operand.vmem [shape: f32[32,48], index: 1, kind: input, shape index: {}]   ;;  %s957_s0 = inlined_call_operand.vmem [shape: bf16[32,32], index: 0, kind: input, shape index: {}]   ;;  %s958_s2 = inlined_call_operand.vmem [shape: bf16[448,192], index: 2, kind: input, shape index: {}]   ;;  %s959_s3 = inlined_call_operand.vmem [shape: f32[32,8], index: 3, kind: output, shape index: {}]  }
   0x1   :  { %v76_v0 = vld [vmem:[%s956_s1] sm:$0xff]  ;;  %v77_v1 = vld [vmem:[%s956_s1 + $0x8] sm:$0xff]  ;;  %v78_v2 = vld [vmem:[%s956_s1 + $0x10] sm:$0xff]  ;;  %343 = vmatprep.subr.bf16.mxu0 %v777_v14  ;;  %vm336_vm2 = vcmask 523264   ;;  %vm438_vm3 = vcmask 785408   ;;  %vm577_vm4 = vcmask 64512  }
   0x2   :  { %v80_v3 = vpack.c.bf16 %v77_v1, %v76_v0  ;;  %v79_v4 = vld [vmem:[%s956_s1 + $0x18] sm:$0xff]  ;;  %v729_v6 = vld [vmem:[%s957_s0] sm:$0xff]   ;;  %v730_v7 = vld [vmem:[%s957_s0 + $0x8] sm:$0xff]   ;;  %v151_v36 = vshrl.u32 %v150_v35, 7 }
   0x3   :  { %v81_v5 = vpack.c.bf16 %v79_v4, %v78_v2  ;;  %698 = vmatprep.mubr.msk.bf16.mxu1 %vm92_vm0, %v729_v6  ;;  %v733_v8 = vld [vmem:[%s958_s2 + $0x4] ss:$8 sps:$4 sm:$0xff]   ;;  %v731_v9 = vld [vmem:[%s958_s2] ss:$8 sps:$4 sm:$0xff]   ;;  %v736_v10 = vld [vmem:[%s958_s2 + $0x14] ss:$8 sps:$4 sm:$0xff]  }
   0x4   :  { %694 = vmatprep.subr.bf16.mxu1 %v80_v3  ;;  %v734_v11 = vld [vmem:[%s958_s2 + $0x10] ss:$8 sps:$4 sm:$0xff]   ;;  %v739_v12 = vld [vmem:[%s958_s2 + $0x24] ss:$8 sps:$4 sm:$0xff]   ;;  %v737_v13 = vld [vmem:[%s958_s2 + $0x20] ss:$8 sps:$4 sm:$0xff]  }
   0x5   :  { %695 = vmatpush3.bf16.msra.mxu1 %v80_v3  ;;  %v740_v15 = vld [vmem:[%s958_s2 + $0x30] ss:$8 sps:$4 sm:$0xff]   ;;  %v741_v16 = vld [vmem:[%s958_s2 + $0x40] ss:$8 sps:$4 sm:$0xff]   ;;  %v881_v39 = vsub.s32 0, %v151_v36 }
   0x6   :  { %696 = vmatprep.subr.bf16.mxu1 %v81_v5  ;;  %344 = vmatpush1.bf16.msra.mxu0 %v740_v15  ;;  %v742_v17 = vld [vmem:[%s958_s2 + $0x50] ss:$8 sps:$4 sm:$0xff]   ;;  %v743_v18 = vld [vmem:[%s958_s2 + $0x60] ss:$8 sps:$4 sm:$0xff]  }
   0x7   :  { %345 = vmatprep.subr.bf16.mxu0 %v777_v14  ;;  %v744_v19 = vld [vmem:[%s958_s2 + $0x70] ss:$8 sps:$4 sm:$0xff]   ;;  %v745_v20 = vld [vmem:[%s958_s2 + $0x80] ss:$8 sps:$4 sm:$0xff]  }
   0x8   :  { %v746_v21 = vld [vmem:[%s958_s2 + $0x90] ss:$8 sps:$4 sm:$0xff]   ;;  %v747_v22 = vld [vmem:[%s958_s2 + $0xa0] ss:$8 sps:$4 sm:$0xff]  }
   0x9   :  { %697 = vmatpush3.bf16.msra.mxu1 %v81_v5  ;;  %v748_v23 = vld [vmem:[%s958_s2 + $0xb0] ss:$8 sps:$4 sm:$0xff]   ;;  %v749_v30 = vld [vmem:[%s958_s2 + $0xc0] ss:$8 sps:$4 sm:$0xff]  }
   0xa   :  { %195 = vmatprep.subr.bf16.mxu1 %v733_v8  ;;  %346 = vmatpush1.bf16.msra.mxu0 %v741_v16  ;;  %v750_v31 = vld [vmem:[%s958_s2 + $0xd0] ss:$8 sps:$4 sm:$0xff]   ;;  %v751_v32 = vld [vmem:[%s958_s2 + $0xe0] ss:$8 sps:$4 sm:$0xff]  }
   0xb   :  { %347 = vmatprep.subr.bf16.mxu0 %v777_v14  ;;  %v752_v33 = vld [vmem:[%s958_s2 + $0xf0] ss:$8 sps:$4 sm:$0xff]   ;;  %v753_v34 = vld [vmem:[%s958_s2 + $0x100] ss:$8 sps:$4 sm:$0xff]  }
   0xc   :  { %699 = vmatmul.mubr.msk.bf16.vlgmr.msra.gmra.mrb[0].mxu1 %vm92_vm0, %v730_v7  ;;  %v63_v37 = vld [vmem:[%s958_s2 + $0x180] sm:$0x11]  ;;  %v754_v7 = vld [vmem:[%s958_s2 + $0x110] ss:$8 sps:$4 sm:$0xff]  }
   0xd   :  { %196 = vmatpush1.bf16.msra.mxu1 %v731_v9  ;;  %227 = vmatprep.mubr.bf16.mxu1 %v777_v14  ;;  %v64_v38 = vunpack.c.l.bf16 %v63_v37  ;;  %v65_v40 = vunpack.c.h.bf16 %v63_v37  ;;  %v755_v8 = vld [vmem:[%s958_s2 + $0x120] ss:$8 sps:$4 sm:$0xff]   ;;  %v756_v9 = vld [vmem:[%s958_s2 + $0x130] ss:$8 sps:$4 sm:$0xff]  }
   0xe   :  { %197 = vmatprep.subr.bf16.mxu1 %v736_v10  ;;  %348 = vmatpush1.bf16.msra.mxu0 %v742_v17  ;;  %v757_v10 = vld [vmem:[%s958_s2 + $0x140] ss:$8 sps:$4 sm:$0xff]  }
   0xf   :  { %349 = vmatprep.subr.bf16.mxu0 %v777_v14  ;;  %v153_v41 = vrot.slane %v64_v38, %v881_v39  ;;  %v157_v42 = vrot.slane %v65_v40, %v881_v39  ;;  %v68_v35 = vld [vmem:[%s958_s2 + $0x1a0] sm:$0x1] }
  0x10   :  { %v69_v36 = vunpack.c.l.bf16 %v68_v35 }
  0x11   :  { %198 = vmatpush1.bf16.msra.mxu1 %v734_v11  ;;  %v758_v11 = vld [vmem:[%s958_s2 + $0x150] ss:$8 sps:$4 sm:$0xff]  }
  0x12   :  { %199 = vmatprep.subr.bf16.mxu1 %v739_v12  ;;  %350 = vmatpush1.bf16.msra.mxu0 %v743_v18  ;;  %v66_v12 = vld [vmem:[%s958_s2 + $0x190] sm:$0x1]  ;;  %v401_v37 = vrot.slane %v69_v36, %v881_v39 }
  0x13   :  { %351 = vmatprep.subr.bf16.mxu0 %v777_v14 }
  0x15   :  { %200 = vmatpush1.bf16.msra.mxu1 %v737_v13  ;;  %v67_v13 = vunpack.c.l.bf16 %v66_v12 }
  0x16   :  { %352 = vmatpush1.bf16.msra.mxu0 %v744_v19  ;;  %702 = vmatprep.subr.bf16.mxu1 %v752_v33 }
  0x17   :  { %353 = vmatprep.subr.bf16.mxu0 %v777_v14 }
  0x1a   :  { %354 = vmatpush1.bf16.msra.mxu0 %v745_v20 }
  0x1b   :  { %355 = vmatprep.subr.bf16.mxu0 %v777_v14 }
  0x1e   :  { %356 = vmatpush1.bf16.msra.mxu0 %v746_v21 }
  0x1f   :  { %357 = vmatprep.subr.bf16.mxu0 %v777_v14 }
  0x22   :  { %358 = vmatpush1.bf16.msra.mxu0 %v747_v22 }
  0x23   :  { %359 = vmatprep.subr.bf16.mxu0 %v777_v14 }
  0x26   :  { %360 = vmatpush1.bf16.msra.mxu0 %v748_v23 }
  0x27   :  { %361 = vmatprep.subr.bf16.mxu0 %v777_v14 }
  0x2a   :  { %362 = vmatpush1.bf16.msra.mxu0 %v749_v30 }
  0x2b   :  { %363 = vmatprep.subr.bf16.mxu0 %v777_v14 }
  0x2e   :  { %364 = vmatpush1.bf16.msra.mxu0 %v750_v31 }
  0x2f   :  { %365 = vmatprep.subr.bf16.mxu0 %v777_v14 }
  0x32   :  { %366 = vmatpush1.bf16.msra.mxu0 %v751_v32 }
  0xdf   :  { %v700_v24 = vpop.f32.mrb[0].mxu1 }
  0xe0   :  { %v133_v25 = vpop.f32.mrb[1].mxu1 }
  0xe1   :  { %v701_v26 = vpop.f32.mrb[2].mxu1 }
  0xe2   :  { %v149_v27 = vpack.c.bf16 %v701_v26, %v700_v24  ;;  %v136_v28 = vpop.f32.mrb[3].mxu1 }
  0xe3   :  { %v148_v29 = vpack.c.bf16 %v136_v28, %v133_v25 }
  0xe5   :  { %648 = vmatmul.mubr.msk.bf16.vlgmr.msra.gmra.mrb[4].mxu1 %vm188_vm1, %v148_v29 }
  0xe6   :  { %237 = vmatprep.mubr.bf16.mxu1 %v777_v14  ;;  %703 = vmatpush3.bf16.msra.mxu1 %v752_v33  ;;  %v263_v14 = vrot.slane %v67_v13, %v881_v39  ;;  %v759_v33 = vld [vmem:[%s958_s2 + $0x160] ss:$8 sps:$4 sm:$0xff]  }
  0xe7   :  { %704 = vmatprep.subr.bf16.mxu1 %v753_v34 }
  0xea   :  { %705 = vmatpush3.bf16.msra.mxu1 %v753_v34  ;;  %v760_v34 = vld [vmem:[%s958_s2 + $0x170] ss:$8 sps:$4 sm:$0xff]  }
  0xeb   :  { %706 = vmatprep.subr.bf16.mxu1 %v754_v7 }
  0xed   :  { %649 = vmatmul.mubr.msk.bf16.gmra.mrb[8].mxu1 %vm188_vm1, %v149_v27 }
  0xee   :  { %707 = vmatpush3.bf16.msra.mxu1 %v754_v7 }
  0xef   :  { %708 = vmatprep.subr.bf16.mxu1 %v755_v8 }
  0xf2   :  { %709 = vmatpush3.bf16.msra.mxu1 %v755_v8 }
  0xf3   :  { %710 = vmatprep.subr.bf16.mxu1 %v756_v9 }
  0xf6   :  { %711 = vmatpush3.bf16.msra.mxu1 %v756_v9 }
  0xf7   :  { %712 = vmatprep.subr.bf16.mxu1 %v757_v10 }
  0xfa   :  { %713 = vmatpush3.bf16.msra.mxu1 %v757_v10 }
  0xfb   :  { %718 = vmatprep.subr.bf16.mxu1 %v758_v11 }
 0x1b8   :  { %v229_v43 = vpop.f32.mrb[4].mxu1 }
 0x1b9   :  { %v230_v44 = vadd.f32 %v229_v43, %v153_v41  ;;  %v231_v45 = vpop.f32.mrb[5].mxu1 }
 0x1ba   :  { %v232_v46 = vadd.f32 %v231_v45, %v157_v42  ;;  %v233_v47 = vpop.f32.mrb[6].mxu1 }
 0x1bb   :  { %v234_v48 = vadd.f32 %v233_v47, %v153_v41  ;;  %v235_v49 = vpop.f32.mrb[7].mxu1  ;;  %v248_v51 = vmax.f32 %v230_v44, 0.0 }
 0x1bc   :  { %v236_v50 = vadd.f32 %v235_v49, %v157_v42  ;;  %v249_v53 = vmax.f32 %v232_v46, 0.0 }
 0x1bd   :  { %v250_v52 = vmax.f32 %v234_v48, 0.0 }
 0x1be   :  { %v251_v54 = vmax.f32 %v236_v50, 0.0 }
 0x1bf   :  { %v256_v55 = vpack.c.bf16 %v250_v52, %v248_v51 }
 0x1c0   :  { %v239_v56 = vpop.f32.mrb[8].mxu1  ;;  %v257_v57 = vpack.c.bf16 %v251_v54, %v249_v53  ;;  %v70_v53 = vld [vmem:[%s958_s2 + $0x1b0] sm:$0x1] }
 0x1c1   :  { %v240_v58 = vadd.f32 %v239_v56, %v153_v41  ;;  %v241_v59 = vpop.f32.mrb[9].mxu1  ;;  %v71_v54 = vunpack.c.l.bf16 %v70_v53 }
 0x1c2   :  { %v242_v60 = vadd.f32 %v241_v59, %v157_v42  ;;  %v243_v61 = vpop.f32.mrb[10].mxu1  ;;  %662 = vmatprep.mubr.msk.bf16.mxu0 %vm336_vm2, %v257_v57 }
 0x1c3   :  { %v244_v62 = vadd.f32 %v243_v61, %v153_v41  ;;  %v245_v63 = vpop.f32.mrb[11].mxu1  ;;  %376 = vmatmul.mubr.bf16.vlgmr.msra.gmra.mrb[0].mxu0 %v256_v55  ;;  %v252_v1 = vmax.f32 %v240_v58, 0.0  ;;  %v503_v55 = vrot.slane %v71_v54, %v881_v39 }
 0x1c4   :  { %v246_v0 = vadd.f32 %v245_v63, %v157_v42  ;;  %v253_v3 = vmax.f32 %v242_v60, 0.0 }
 0x1c5   :  { %v254_v2 = vmax.f32 %v244_v62, 0.0 }
 0x1c6   :  { %v255_v4 = vmax.f32 %v246_v0, 0.0 }
 0x1c7   :  { %v258_v5 = vpack.c.bf16 %v254_v2, %v252_v1 }
 0x1c8   :  { %v259_v6 = vpack.c.bf16 %v255_v4, %v253_v3 }
 0x1ca   :  { %663 = vmatprep.mubr.msk.bf16.mxu0 %vm336_vm2, %v259_v6 }
 0x1cb   :  { %384 = vmatmul.mubr.bf16.gmra.mrb[4].mxu0 %v258_v5 }
 0x296   :  { %v377_v15 = vpop.f32.mrb[0].mxu0 }
 0x297   :  { %v378_v16 = vadd.f32 %v377_v15, %v263_v14  ;;  %v379_v17 = vpop.f32.mrb[1].mxu0 }
 0x298   :  { %v380_v18 = vpop.f32.mrb[2].mxu0 }
 0x299   :  { %v381_v19 = vadd.f32 %v380_v18, %v263_v14  ;;  %v382_v20 = vpop.f32.mrb[3].mxu0  ;;  %v392_v21 = vmax.f32 %v378_v16, 0.0 }
 0x29b   :  { %v393_v22 = vmax.f32 %v381_v19, 0.0 }
 0x29d   :  { %v396_v23 = vpack.c.bf16 %v393_v22, %v392_v21 }
 0x29e   :  { %v385_v24 = vpop.f32.mrb[4].mxu0 }
 0x29f   :  { %v386_v25 = vadd.f32 %v385_v24, %v263_v14  ;;  %v387_v26 = vpop.f32.mrb[5].mxu0  ;;  %714 = vmatprep.mubr.msk.bf16.mxu1 %vm438_vm3, %v396_v23 }
 0x2a0   :  { %v388_v27 = vpop.f32.mrb[6].mxu0 }
 0x2a1   :  { %v389_v28 = vadd.f32 %v388_v27, %v263_v14  ;;  %v390_v29 = vpop.f32.mrb[7].mxu0  ;;  %v394_v30 = vmax.f32 %v386_v25, 0.0 }
 0x2a3   :  { %v395_v31 = vmax.f32 %v389_v28, 0.0 }
 0x2a5   :  { %v397_v32 = vpack.c.bf16 %v395_v31, %v394_v30 }
 0x2a7   :  { %715 = vmatmul.mubr.msk.bf16.vlgmr.msra.gmra.mrb[12].mxu1 %vm438_vm3, %v397_v32 }
 0x2a8   :  { %719 = vmatpush3.bf16.msra.mxu1 %v758_v11 }
 0x2a9   :  { %720 = vmatprep.subr.bf16.mxu1 %v759_v33 }
 0x2ac   :  { %721 = vmatpush3.bf16.msra.mxu1 %v759_v33 }
 0x2ad   :  { %722 = vmatprep.subr.bf16.mxu1 %v760_v34 }
 0x2b0   :  { %723 = vmatpush3.bf16.msra.mxu1 %v760_v34 }
 0x37a   :  { %v716_v38 = vpop.f32.mrb[12].mxu1 }
 0x37b   :  { %v488_v40 = vadd.f32 %v716_v38, %v401_v37  ;;  %v479_v41 = vpop.f32.mrb[13].mxu1 }
 0x37c   :  { %v480_v42 = vadd.f32 %v479_v41, %v401_v37  ;;  %v717_v43 = vpop.f32.mrb[14].mxu1 }
 0x37d   :  { %v491_v44 = vadd.f32 %v717_v43, %v401_v37  ;;  %v482_v45 = vpop.f32.mrb[15].mxu1  ;;  %v496_v47 = vmax.f32 %v488_v40, 0.0 }
 0x37e   :  { %v483_v46 = vadd.f32 %v482_v45, %v401_v37  ;;  %v494_v49 = vmax.f32 %v480_v42, 0.0 }
 0x37f   :  { %v497_v48 = vmax.f32 %v491_v44, 0.0 }
 0x380   :  { %v495_v50 = vmax.f32 %v483_v46, 0.0 }
 0x381   :  { %v499_v51 = vpack.c.bf16 %v497_v48, %v496_v47 }
 0x382   :  { %v498_v52 = vpack.c.bf16 %v495_v50, %v494_v49 }
 0x384   :  { %724 = vmatprep.mubr.msk.bf16.mxu1 %vm188_vm1, %v498_v52 }
 0x385   :  { %725 = vmatmul.mubr.msk.bf16.vlgmr.msra.gmra.mrb[16].mxu1 %vm188_vm1, %v499_v51 }
 0x458   :  { %v726_v56 = vpop.f32.mrb[16].mxu1 }
 0x459   :  { %v922_v57 = vadd.f32 %v726_v56, %v503_v55  ;;  %v562_v58 = vpop.f32.mrb[17].mxu1 }
 0x45a   :  { %v563_v59 = vadd.f32 %v562_v58, %v503_v55  ;;  %v727_v60 = vpop.f32.mrb[18].mxu1 }
 0x45b   :  { %v924_v61 = vadd.f32 %v727_v60, %v503_v55  ;;  %v565_v62 = vpop.f32.mrb[19].mxu1  ;;  %v584_v63 = vsel %vm577_vm4, %v922_v57, -inf }
 0x45c   :  { %v566_v0 = vadd.f32 %v565_v62, %v503_v55  ;;  %585 = vmax.xlane.f32.xlu1 %v584_v63  ;;  %v578_v1 = vsel %vm577_vm4, %v563_v59, -inf }
 0x45d   :  { %579 = vmax.xlane.f32.xlu0 %v578_v1  ;;  %v587_v39 = vsel %vm577_vm4, %v924_v61, -inf }
 0x45e   :  { %v581_v2 = vsel %vm577_vm4, %v566_v0, -inf }
 0x460   :  { %588 = vmax.xlane.f32.xlu1 %v587_v39 }
 0x461   :  { %582 = vmax.xlane.f32.xlu0 %v581_v2 }
 0x4e9   :  { %v586_v3 = vpop.xlane.xlu1 %585 }
 0x4ea   :  { %v592_v4 = vsub.f32 %v922_v57, %v586_v3  ;;  %v580_v5 = vpop.xlane.xlu0 %579 }
 0x4eb   :  { %v590_v6 = vsub.f32 %v563_v59, %v580_v5 }
 0x4ec   :  { %v598_v7 = vmul.f32 1.442695, %v592_v4 }
 0x4ed   :  { %v594_v8 = vmul.f32 1.442695, %v590_v6  ;;  %v589_v9 = vpop.xlane.xlu1 %588 }
 0x4ee   :  { %v593_v10 = vsub.f32 %v924_v61, %v589_v9  ;;  %v583_v11 = vpop.xlane.xlu0 %582 }
 0x4ef   :  { %761 = vpow2.f32 %v594_v8  ;;  %v591_v12 = vsub.f32 %v566_v0, %v583_v11 }
 0x4f0   :  { %763 = vpow2.f32 %v598_v7  ;;  %v600_v13 = vmul.f32 1.442695, %v593_v10 }
 0x4f1   :  { %v596_v14 = vmul.f32 1.442695, %v591_v12 }
 0x4f3   :  { %765 = vpow2.f32 %v596_v14 }
 0x4f4   :  { %767 = vpow2.f32 %v600_v13 }
 0x4f9   :  { %v762_v15 = vpop.eup %761 }
 0x4fa   :  { %v602_v16 = vsel %vm577_vm4, %v762_v15, 0.0  ;;  %v764_v17 = vpop.eup %763 }
 0x4fb   :  { %603 = vadd.xlane.f32.xlu0 %v602_v16  ;;  %v608_v19 = vsel %vm577_vm4, %v764_v17, 0.0 }
 0x4fd   :  { %v766_v18 = vpop.eup %765 }
 0x4fe   :  { %v605_v20 = vsel %vm577_vm4, %v766_v18, 0.0  ;;  %v768_v21 = vpop.eup %767 }
 0x4ff   :  { %609 = vadd.xlane.f32.xlu0 %v608_v19  ;;  %606 = vadd.xlane.f32.xlu1 %v605_v20  ;;  %v611_v22 = vsel %vm577_vm4, %v768_v21, 0.0 }
 0x503   :  { %612 = vadd.xlane.f32.xlu1 %v611_v22 }
 0x588   :  { %v604_v23 = vpop.xlane.xlu0 %603 }
 0x589   :  { %769 = vlog2.f32 %v604_v23 }
 0x58c   :  { %v607_v24 = vpop.xlane.xlu1 %606  ;;  %v610_v25 = vpop.xlane.xlu0 %609 }
 0x58d   :  { %771 = vlog2.f32 %v607_v24 }
 0x58e   :  { %773 = vlog2.f32 %v610_v25 }
 0x590   :  { %v613_v26 = vpop.xlane.xlu1 %612 }
 0x591   :  { %775 = vlog2.f32 %v613_v26 }
 0x593   :  { %v770_v27 = vpop.eup %769 }
 0x594   :  { %v615_v28 = vmul.f32 0.6931472, %v770_v27 }
 0x596   :  { %v622_v29 = vadd.f32 %v615_v28, %v580_v5 }
 0x597   :  { %v772_v30 = vpop.eup %771 }
 0x598   :  { %v774_v31 = vpop.eup %773  ;;  %v626_v32 = vsub.f32 %v563_v59, %v622_v29  ;;  %v617_v33 = vmul.f32 0.6931472, %v772_v30 }
 0x599   :  { %v619_v34 = vmul.f32 0.6931472, %v774_v31 }
 0x59a   :  { %630 = vst.msk [vmem:[%s959_s3] sm:$0xff] %vm577_vm4, %v626_v32  ;;  %v623_v35 = vadd.f32 %v617_v33, %v583_v11 }
 0x59b   :  { %v776_v36 = vpop.eup %775  ;;  %v624_v37 = vadd.f32 %v619_v34, %v586_v3 }
 0x59c   :  { %v627_v38 = vsub.f32 %v566_v0, %v623_v35  ;;  %v621_v40 = vmul.f32 0.6931472, %v776_v36 }
 0x59d   :  { %v628_v41 = vsub.f32 %v922_v57, %v624_v37 }
 0x59e   :  { %631 = vst.msk [vmem:[%s959_s3 + $0x8] sm:$0xff] %vm577_vm4, %v627_v38  ;;  %v625_v42 = vadd.f32 %v621_v40, %v589_v9 }
 0x59f   :  { %632 = vst.msk [vmem:[%s959_s3 + $0x10] sm:$0xff] %vm577_vm4, %v628_v41 }
 0x5a0   :  { %v629_v43 = vsub.f32 %v924_v61, %v625_v42 }
 0x5a2   :  { %633 = vst.msk [vmem:[%s959_s3 + $0x18] sm:$0xff] %vm577_vm4, %v629_v43 }

</bundles_post_ra>
